<compile_context>
chip_gen: v7x
topology: tpu7x:2x2x1
jax: 0.10.0
libtpu: 0.0.40
codegen_flags: <defaults>
</compile_context>

<pallas_src>
import jax
import jax.numpy as jnp
from jax.experimental import pallas as pl
from jax.experimental.pallas import tpu as pltpu


def _round_up(x, m):
    return ((x + m - 1) // m) * m


def _linear_kernel(x_ref, w_ref, b_ref, o_ref):
    # x_ref: [TM, H] f32   w_ref: [H, H] bf16   b_ref: [1, H] f32
    # o_ref: [TM, H] (output dtype)
    # Fused activation cast: f32 tile -> bf16 MXU operand, f32 accumulation.
    x_bf = x_ref[...].astype(jnp.bfloat16)
    acc = jnp.dot(x_bf, w_ref[...], preferred_element_type=jnp.float32)
    # Bias add + cast in the f32 epilogue (no bf16 elementwise work -> v5e safe).
    o_ref[...] = (acc + b_ref[...]).astype(o_ref.dtype)


def linear_forward(x, w_bf16, b2d_f32, *, tm_max=4096):
    """y = x @ W + b as a gridded Pallas kernel.

    x: [B, S, H] f32, w_bf16: [H, H] bf16 (pre-cast once), b2d_f32: [1, H] f32.
    Returns y: [B, S, H] in x.dtype.
    """
    B, S, H = x.shape
    M = B * S

    # Tile over M: cap at tm_max rows, round to a multiple of 16 so bf16 x
    # tiles are full sublane-packed vregs.
    TM = min(tm_max, _round_up(M, 16))
    Mp = _round_up(M, TM)

    # v7x dual-TC: when there is enough work, guarantee >= 2 grid steps so the
    # "parallel" M axis can actually be sharded across both TensorCores.
    if Mp // TM == 1 and Mp >= 32:
        TM = _round_up(Mp // 2, 16)
        Mp = _round_up(M, TM)

    x2d = x.reshape(M, H)
    if Mp != M:
        x2d = jnp.pad(x2d, ((0, Mp - M), (0, 0)))  # row pad only (no cast/lane pad)

    grid = (Mp // TM,)

    y2d = pl.pallas_call(
        _linear_kernel,
        out_shape=jax.ShapeDtypeStruct((Mp, H), x.dtype),
        grid_spec=pltpu.PrefetchScalarGridSpec(
            num_scalar_prefetch=0,
            grid=grid,
            in_specs=[
                pl.BlockSpec((TM, H), lambda i: (i, 0)),  # x tile, pipelined over M
                pl.BlockSpec((H, H), lambda i: (0, 0)),   # W resident across grid
                pl.BlockSpec((1, H), lambda i: (0, 0)),   # bias resident
            ],
            out_specs=pl.BlockSpec((TM, H), lambda i: (i, 0)),
        ),
        compiler_params=pltpu.CompilerParams(
            dimension_semantics=("parallel",),  # M axis is independent work
            # No vmem_limit_bytes override: per-step footprint is ~2 MiB even at
            # TM=4096, far below the default scoped limit on v5e/v6e/v7x.
        ),
    )(x2d, w_bf16, b2d_f32)

    if Mp != M:
        y2d = y2d[:M]
    return y2d.reshape(B, S, H)


class PallasLinear:
    """Pallas-backed Linear layer: y = x @ W + b.

    Weight/bias preparation (bf16 cast, 2D bias) is done ONCE at construction
    time, not per forward call.
    """

    # Below this many activation elements a single fused XLA matmul is cheaper
    # than kernel launch + DMA overhead.
    _SMALL_PROBLEM_ELEMS = 64 * 1024

    def __init__(self, w, b, *, tm_max=4096, force_pallas=False):
        self.w_f32 = jnp.asarray(w, dtype=jnp.float32)
        self.b_f32 = jnp.asarray(b, dtype=jnp.float32)
        # Hoisted, computed once:
        self.w_bf16 = self.w_f32.astype(jnp.bfloat16)
        self.b2d = self.b_f32.reshape(1, -1)
        self.tm_max = tm_max
        self.force_pallas = force_pallas

    def __call__(self, x):
        B, S, H = x.shape
        if (not self.force_pallas) and (B * S * H < self._SMALL_PROBLEM_ELEMS):
            # Small-problem fast path: plain fused XLA matmul.
            return x @ self.w_f32 + self.b_f32
        return linear_forward(x, self.w_bf16, self.b2d, tm_max=self.tm_max)


class Modifier:
    """JAX analogue of chunkoptim.modifier.Modifier.

    forward(*args, **kwargs) delegates to the wrapped model callable,
    which here is the Pallas-backed linear layer above.
    """

    def __init__(self, model, save_ckp=None, load_ckp=None):
        self.model = model
        self.save_ckp = save_ckp
        self.load_ckp = load_ckp
        # TODO(synk): checkpoint loading intentionally omitted (host file I/O).

    def forward(self, *args, **kwargs):
        return self.model(*args, **kwargs)

    def __call__(self, *args, **kwargs):
        return self.forward(*args, **kwargs)


if __name__ == "__main__":
    B, S, H = 2, 8, 32

    key = jax.random.PRNGKey(0)
    kx, kw, kb = jax.random.split(key, 3)

    x = jax.random.normal(kx, (B, S, H), dtype=jnp.float32)
    w = jax.random.normal(kw, (H, H), dtype=jnp.float32) * 0.02
    b = jax.random.normal(kb, (H,), dtype=jnp.float32) * 0.02

    # The wrapped "model": a Pallas-backed linear layer.  force_pallas=True so
    # the kernel path is exercised even at this tiny demo size.
    model = PallasLinear(w, b, force_pallas=True)
    modifier = Modifier(model, save_ckp=None, load_ckp=None)

    y = modifier(x)
    y = jax.block_until_ready(y)

    # Correctness check against plain-JAX references.
    y_ref_f32 = x @ w + b
    y_ref_bf16 = (
        jnp.dot(
            x.astype(jnp.bfloat16).reshape(B * S, H),
            w.astype(jnp.bfloat16),
            preferred_element_type=jnp.float32,
        ).reshape(B, S, H)
        + b
    )
    assert y.shape == (B, S, H)
    assert jnp.allclose(y, y_ref_bf16, atol=1e-3, rtol=1e-3)
    assert jnp.allclose(y, y_ref_f32, atol=2e-2, rtol=2e-2)

    # Sanity-check the small-problem fast path of the wrapper as well.
    y_fast = jax.block_until_ready(PallasLinear(w, b)(x))
    assert jnp.allclose(y_fast, y_ref_f32, atol=1e-5, rtol=1e-5)

    print("KERNEL_OK")
</pallas_src>

<mosaic_0001>
module attributes {stable_mosaic.version = 11 : i64} {
  func.func @_linear_kernel(%arg0: i32, %arg1: memref<16x32xf32, #tpu.memory_space<vmem>>, %arg2: memref<32x32xbf16, #tpu.memory_space<vmem>>, %arg3: memref<1x32xf32, #tpu.memory_space<vmem>>, %arg4: memref<16x32xf32, #tpu.memory_space<vmem>>) attributes {dimension_semantics = [#tpu.dimension_semantics<parallel>], iteration_bounds = array<i64: 1>, scalar_prefetch = 0 : i64, scratch_operands = 0 : i64, tpu.core_type = #tpu.core_type<tc>, window_params = [{transform_indices = @transform_0, window_bounds = array<i64: 16, 32>}, {pipeline_mode = #tpu.pipeline_mode<synchronous>, transform_indices = @transform_1, window_bounds = array<i64: 32, 32>}, {pipeline_mode = #tpu.pipeline_mode<synchronous>, transform_indices = @transform_2, window_bounds = array<i64: 1, 32>}, {transform_indices = @transform_3, window_bounds = array<i64: 16, 32>}]} {
    %c0 = arith.constant 0 : index
    %c0_0 = arith.constant 0 : index
    %0 = vector.load %arg1[%c0, %c0_0] : memref<16x32xf32, #tpu.memory_space<vmem>>, vector<16x32xf32>
    %1 = arith.truncf %0 : vector<16x32xf32> to vector<16x32xbf16>
    %c0_1 = arith.constant 0 : index
    %c0_2 = arith.constant 0 : index
    %2 = vector.load %arg2[%c0_1, %c0_2] : memref<32x32xbf16, #tpu.memory_space<vmem>>, vector<32x32xbf16>
    %cst = arith.constant dense<0.000000e+00> : vector<16x32xf32>
    %3 = tpu.matmul %1, %2, %cst {dimension_numbers = #tpu.dot_dimension_numbers<[1], [0], [0], [1], [0, 0, 1, 1], [], []>} : vector<16x32xbf16>, vector<32x32xbf16>, vector<16x32xf32> -> vector<16x32xf32>
    %c0_3 = arith.constant 0 : index
    %c0_4 = arith.constant 0 : index
    %4 = vector.load %arg3[%c0_3, %c0_4] : memref<1x32xf32, #tpu.memory_space<vmem>>, vector<1x32xf32>
    %5 = vector.broadcast %4 : vector<1x32xf32> to vector<16x32xf32>
    %6 = arith.addf %3, %5 : vector<16x32xf32>
    %c0_5 = arith.constant 0 : index
    %c0_6 = arith.constant 0 : index
    %7 = vector.load %arg4[%c0_5, %c0_6] : memref<16x32xf32, #tpu.memory_space<vmem>>, vector<16x32xf32>
    tpu.vector_store %arg4[%c0_5, %c0_6], %6 {strides = array<i32>} : memref<16x32xf32, #tpu.memory_space<vmem>>, vector<16x32xf32>,
    return
  }
  func.func @transform_0(%arg0: i32) -> (i32, i32) {
    %c0_i32 = arith.constant 0 : i32
    %c0_i32_0 = arith.constant 0 : i32
    return %arg0, %c0_i32 : i32, i32
  }
  func.func @transform_1(%arg0: i32) -> (i32, i32) {
    %c0_i32 = arith.constant 0 : i32
    %c0_i32_0 = arith.constant 0 : i32
    %c0_i32_1 = arith.constant 0 : i32
    return %c0_i32, %c0_i32_0 : i32, i32
  }
  func.func @transform_2(%arg0: i32) -> (i32, i32) {
    %c0_i32 = arith.constant 0 : i32
    %c0_i32_0 = arith.constant 0 : i32
    %c0_i32_1 = arith.constant 0 : i32
    return %c0_i32, %c0_i32_0 : i32, i32
  }
  func.func @transform_3(%arg0: i32) -> (i32, i32) {
    %c0_i32 = arith.constant 0 : i32
    %c0_i32_0 = arith.constant 0 : i32
    return %arg0, %c0_i32 : i32, i32
  }
}

</mosaic_0001>

<bundles_post_ra>
// kernel: tpu_custom_call.1
= control target key start
LH: loop header
LB: loop body
LE: loop exit
PB: predicated region body
PF: predicated region fallthrough
CT: control target
= control target key end

     0   :  { %8 = vsyncpa [#allocation3], 0  ;;  %s307_s0 = inlined_call_operand.hbm [shape: f32[16,32], index: 0, kind: input, shape index: {}]   ;;  %s308_s1 = inlined_call_operand.hbm [shape: bf16[32,32], index: 1, kind: input, shape index: {}]   ;;  %s309_s2 = inlined_call_operand.vmem [shape: f32[1,32], index: 2, kind: input, shape index: {}]   ;;  %s310_s3 = inlined_call_operand.hbm [shape: f32[16,32], index: 3, kind: output, shape index: {}]  }
   0x1   :  { %9 = vsyncpa [#allocation6], 0 }
   0x2   :  { %10 = vsyncpa [#allocation4], 0  ;;  %s233_s12 = smov [#allocation2]   ;;  %s161_s16 = scalar_lea.hbm %s307_s0, 256 }
   0x3   :  { %s16_s13 = sshll.u32 %s233_s12, 4  ;;  %p162_p0 = scmp.ne.s32.totalorder %s307_s0, %s161_s16  ;;  %s17_s13 = int_to_ptr.vmem [resolvable:$true] %s16_s13 }
   0x4   :  { %p165_p1 = scmp.lt.u32.totalorder %s161_s16, %s307_s0 }
   0x6   :  { %p167_p2 = pnand %p165_p1, %p162_p0 }
   0x8   :  { %170 = shalt.err (!%p167_p2)
}
   0x9   :  { %s171_s21 = scalar_lea.vmem %s17_s13, 256  ;;  %p176_p4 = scmp.lt.s32.totalorder %s17_s13, %s17_s13 }
   0xa   :  { %p172_p3 = scmp.ne.s32.totalorder %s17_s13, %s171_s21  ;;  %p177_p5 = scmp.lt.s32.totalorder %s171_s21, %s171_s21 }
   0xc   :  { %p178_p6 = por %p177_p5, %p176_p4 }
   0xe   :  { %p179_p7 = pnand %p178_p6, %p172_p3 }
  0x10   :  { %182 = shalt.err (!%p179_p7)
}
  0x11   :  { %s234_s22 = smov 128   ;;  %s235_s23 = smov 8  }
  0x12   :  { %22 = dma.hbm_to_vmem [thread:$0]  %s307_s0, 256, %s17_s13, [#allocation3], %s234_s22, %s234_s22, %s235_s23  }
  0x13   :  { %s236_s26 = smov [#allocation5]   ;;  %s183_s30 = scalar_lea.hbm %s308_s1, 256 }
  0x14   :  { %s28_s27 = sshll.u32 %s236_s26, 4  ;;  %p184_p8 = scmp.ne.s32.totalorder %s308_s1, %s183_s30  ;;  %s29_s27 = int_to_ptr.vmem [resolvable:$true] %s28_s27 }
  0x15   :  { %p187_p9 = scmp.lt.u32.totalorder %s183_s30, %s308_s1 }
  0x17   :  { %p189_p10 = pnand %p187_p9, %p184_p8 }
  0x19   :  { %192 = shalt.err (!%p189_p10)
}
  0x1a   :  { %s193_s8 = scalar_lea.vmem %s29_s27, 256  ;;  %p198_p12 = scmp.lt.s32.totalorder %s29_s27, %s29_s27 }
  0x1b   :  { %p194_p11 = scmp.ne.s32.totalorder %s29_s27, %s193_s8  ;;  %p199_p13 = scmp.lt.s32.totalorder %s193_s8, %s193_s8 }
  0x1d   :  { %p200_p0 = por %p199_p13, %p198_p12 }
  0x1f   :  { %p201_p1 = pnand %p200_p0, %p194_p11 }
  0x21   :  { %204 = shalt.err (!%p201_p1)
}
  0x22   :  { %s237_s0 = smov 64   ;;  %s238_s9 = smov 4  }
  0x23   :  { %34 = dma.hbm_to_vmem [thread:$0]  %s308_s1, 256, %s29_s27, [#allocation6], %s237_s0, %s237_s0, %s238_s9  }
  0x24   :  { %227 = dma.done.wait [#allocation3], 256  }
  0x25   :  { %228 = vsyncadd [#allocation3], 4294967040 }
  0x26   :  { %229 = dma.done.wait [#allocation6], 256  }
  0x27   :  { %230 = vsyncadd [#allocation6], 4294967040  ;;  %v239_v0 = vmov 0.0   ;;  %vm240_vm0 = vmmov 0   ;;  %v159_v1 = vld [vmem:[#allocation5] sm:$0xff]   ;;  %v160_v2 = vld [vmem:[#allocation5 + $0x8] sm:$0xff]  }
  0x28   :  { %142 = vmatprep.subr.bf16.mxu0 %v239_v0  ;;  %146 = vmatprep.mubr.msk.bf16.mxu0 %vm240_vm0, %v239_v0  ;;  %v44_v3 = vld [vmem:[#allocation2] sm:$0xff]  ;;  %v45_v4 = vld [vmem:[#allocation2 + $0x8] sm:$0xff]  ;;  %vm70_vm1 = vcmask 261120   ;;  %s241_s13 = smov [#allocation7]  }
  0x29   :  { %143 = vmatpush3.bf16.msra.mxu0 %v159_v1  ;;  %v46_v5 = vpack.c.bf16 %v45_v4, %v44_v3  ;;  %v135_v6 = vld [vmem:[%s309_s2] ss:$0 sm:$0xff]  ;;  %s122_s14 = sshll.u32 %s241_s13, 4  ;;  %s123_s14 = int_to_ptr.vmem [resolvable:$true] %s122_s14 }
  0x2a   :  { %144 = vmatprep.subr.bf16.mxu0 %v239_v0  ;;  %s205_s15 = scalar_lea.vmem %s123_s14, 256  ;;  %p210_p3 = scmp.lt.s32.totalorder %s123_s14, %s123_s14 }
  0x2b   :  { %p206_p2 = scmp.ne.s32.totalorder %s123_s14, %s205_s15  ;;  %p211_p4 = scmp.lt.s32.totalorder %s205_s15, %s205_s15 }
  0x2d   :  { %145 = vmatpush3.bf16.msra.mxu0 %v160_v2  ;;  %p212_p5 = por %p211_p4, %p210_p3 }
  0x2f   :  { %p213_p6 = pnand %p212_p5, %p206_p2 }
  0x30   :  { %147 = vmatmul.mubr.msk.bf16.vlgmr.msra.gmra.mrb[0].mxu0 %vm70_vm1, %v46_v5 }
 0x103   :  { %v108_v7 = vpop.f32.mrb[0].mxu0 }
 0x104   :  { %v109_v8 = vadd.f32 %v135_v6, %v108_v7  ;;  %v148_v9 = vpop.f32.mrb[1].mxu0 }
 0x105   :  { %v111_v10 = vpop.f32.mrb[2].mxu0 }
 0x106   :  { %115 = vst.msk [vmem:[#allocation7] sm:$0xff] %vm70_vm1, %v109_v8  ;;  %v112_v11 = vadd.f32 %v135_v6, %v111_v10  ;;  %v149_v12 = vpop.f32.mrb[3].mxu0 }
 0x108   :  { %116 = vst.msk [vmem:[#allocation7 + $0x8] sm:$0xff] %vm70_vm1, %v112_v11 }
 0x109   :  { %216 = shalt.err (!%p213_p6)
}
 0x10a   :  { %s217_s17 = scalar_lea.hbm %s310_s3, 256 }
 0x10b   :  { %p218_p7 = scmp.ne.s32.totalorder %s310_s3, %s217_s17  ;;  %p221_p8 = scmp.lt.u32.totalorder %s217_s17, %s310_s3 }
 0x10d   :  { %p223_p9 = pnand %p221_p8, %p218_p7 }
 0x10f   :  { %226 = shalt.err (!%p223_p9)
}
 0x110   :  { %128 = dma.vmem_to_hbm [thread:$0]  %s123_s14, 256, %s310_s3, [#allocation4], %s234_s22, %s234_s22, %s235_s23  }
 0x111   :  { %231 = dma.done.wait [#allocation4], 256  }
 0x112   :  { %232 = vsyncadd [#allocation4], 4294967040 }
 0x113   :  { %132 = vsyncpa [#allocation3], 1 }
 0x114   :  { %133 = vsyncpa [#allocation6], 1 }
 0x115   :  { %134 = vsyncpa [#allocation4], 1 }

</bundles_post_ra>
